<compile_context>
chip_gen: v7x
topology: tpu7x:2x2x1
jax: 0.10.0
libtpu: 0.0.40
codegen_flags: <defaults>
</compile_context>

<pallas_src>
import jax
import jax.numpy as jnp
from jax.experimental import pallas as pl
from jax.experimental.pallas import tpu as pltpu

_H1 = 128          # fc1 width
_H2 = 64           # fc2 width (logical, as in the PyTorch module)
_H2P = 128         # fc2 width padded to the lane quantum (done once at init)
_TB_MAX = 2048     # max row-block size (multiple of 256; ~2.5 MiB VMEM per block)


def _dqn_kernel(x_ref, w1_ref, b1_ref, w2_ref, b2_ref, w3_ref, b3_ref,
                q_ref, act_ref):
    x = x_ref[...].astype(jnp.float32)              # [TB, in_dim]
    w1 = w1_ref[...]                                # [in_dim, 128] f32
    in_dim = w1_ref.shape[0]

    # Layer 1: contraction depth is tiny (CartPole: 4) -> `in_dim` broadcast FMAs
    # on the VPU instead of a nearly-empty MXU dot (no K padding of activations).
    if in_dim <= 16:
        acc = x[:, 0:1] * w1[0:1, :]
        for k in range(1, in_dim):
            acc = acc + x[:, k:k + 1] * w1[k:k + 1, :]
    else:  # generic fallback for larger input dims
        acc = jnp.dot(x, w1, preferred_element_type=jnp.float32)
    h1 = jnp.maximum(acc + b1_ref[...], 0.0)        # [TB, 128] f32

    # Layers 2/3: bf16 MXU operands, f32 accumulation.  All N/K dims lane dense;
    # padded columns/rows are exact zeros through bias+ReLU.
    h2 = jnp.maximum(
        jnp.dot(h1.astype(jnp.bfloat16), w2_ref[...],
                preferred_element_type=jnp.float32) + b2_ref[...],
        0.0)                                        # [TB, 128] (cols 64.. are 0)
    q = (jnp.dot(h2.astype(jnp.bfloat16), w3_ref[...],
                 preferred_element_type=jnp.float32) + b3_ref[...])
    q_ref[...] = q.astype(q_ref.dtype)

    # Fused greedy-action epilogue (first index attaining the max Q) - a couple of
    # VPU compares plus a lane reduce; saves a second dispatch + HBM round-trip in
    # the per-environment-step action-selection loop.
    out_dim = q.shape[-1]
    col = jax.lax.broadcasted_iota(jnp.int32, q.shape, 1)
    qmax = jnp.max(q, axis=-1, keepdims=True)
    act = jnp.min(jnp.where(q == qmax, col, out_dim), axis=-1, keepdims=True)
    act_ref[...] = act.astype(jnp.int32)


def prepare_params(params):
    """One-time parameter layout prep (runs OUTSIDE the per-step hot path).

    Biases become [1, H] f32 rows; fc2/fc3 are zero-padded along the 64-wide
    hidden dim to 128 and stored as bf16 (MXU-native operands).  Zeros stay zero
    through bias+ReLU and the padded w3 rows contribute nothing.
    """
    f32, bf16 = jnp.float32, jnp.bfloat16
    w1 = params["w1"].astype(f32)                                        # [in, 128]
    b1 = params["b1"].astype(f32).reshape(1, _H1)                        # [1, 128]
    w2 = jnp.pad(params["w2"].astype(f32), ((0, 0), (0, _H2P - _H2))).astype(bf16)
    b2 = jnp.pad(params["b2"].astype(f32), (0, _H2P - _H2)).reshape(1, _H2P)
    w3 = jnp.pad(params["w3"].astype(f32), ((0, _H2P - _H2), (0, 0))).astype(bf16)
    b3 = params["b3"].astype(f32).reshape(1, -1)                         # [1, out]
    return {"w1": w1, "b1": b1, "w2": w2, "b2": b2, "w3": w3, "b3": b3}


def _round_up(n, m):
    return (n + m - 1) // m * m


def _pick_block(B):
    """Row-block size.  B<=8: one full-array block (exempt from (8,128)).
    Otherwise aim for >= 2 blocks so v7x's 2 TensorCores both get work, rounded
    to a sublane multiple (or to 256 for large blocks), capped at _TB_MAX."""
    if B <= 8:
        return B
    tb = pl.cdiv(B, 2)
    tb = _round_up(tb, 256 if tb > 256 else 8)
    return min(tb, _TB_MAX)


@jax.jit
def dqn_forward(x, prepared):
    """x: [B, input_dim] f32 -> (Q-values [B, out] f32, greedy action [B, 1] i32)."""
    B, in_dim = x.shape
    out_dim = prepared["w3"].shape[1]

    tb = _pick_block(B)
    grid = (pl.cdiv(B, tb),)

    row = lambda shape: pl.BlockSpec(shape, lambda i: (i, 0))       # streamed per block
    pinned = lambda shape: pl.BlockSpec(shape, lambda i: (0, 0))    # VMEM-resident

    return pl.pallas_call(
        _dqn_kernel,
        out_shape=(jax.ShapeDtypeStruct((B, out_dim), jnp.float32),
                   jax.ShapeDtypeStruct((B, 1), jnp.int32)),
        grid=grid,
        in_specs=[
            row((tb, in_dim)),
            pinned((in_dim, _H1)),
            pinned((1, _H1)),
            pinned((_H1, _H2P)),
            pinned((1, _H2P)),
            pinned((_H2P, out_dim)),
            pinned((1, out_dim)),
        ],
        out_specs=(row((tb, out_dim)), row((tb, 1))),
        compiler_params=pltpu.CompilerParams(dimension_semantics=("parallel",)),
    )(x, prepared["w1"], prepared["b1"], prepared["w2"], prepared["b2"],
      prepared["w3"], prepared["b3"])


def init_dqn_params(key, input_dim, output_dim):
    """nn.Linear-style init (uniform +-1/sqrt(fan_in)); weights stored [in, out]."""
    def linear(k, fan_in, fan_out):
        kw, kb = jax.random.split(k)
        bound = 1.0 / jnp.sqrt(float(fan_in))
        w = jax.random.uniform(kw, (fan_in, fan_out), jnp.float32, -bound, bound)
        b = jax.random.uniform(kb, (fan_out,), jnp.float32, -bound, bound)
        return w, b

    k1, k2, k3 = jax.random.split(key, 3)
    w1, b1 = linear(k1, input_dim, _H1)
    w2, b2 = linear(k2, _H1, _H2)
    w3, b3 = linear(k3, _H2, output_dim)
    return {"w1": w1, "b1": b1, "w2": w2, "b2": b2, "w3": w3, "b3": b3}


def dqn_reference(x, params):
    """Pure-JAX f32 reference of the PyTorch forward."""
    h1 = jnp.maximum(
        jnp.dot(x, params["w1"], precision=jax.lax.Precision.HIGHEST) + params["b1"],
        0.0)
    h2 = jnp.maximum(h1 @ params["w2"] + params["b2"], 0.0)
    return h2 @ params["w3"] + params["b3"]


if __name__ == "__main__":
    INPUT_DIM = 4    # CartPole observation size
    OUTPUT_DIM = 2   # CartPole action count

    key = jax.random.PRNGKey(0)
    k_params, k_small, k_big = jax.random.split(key, 3)
    params = init_dqn_params(k_params, INPUT_DIM, OUTPUT_DIM)
    prepared = prepare_params(params)   # one-time; NOT in the per-step path

    # Small batch (action selection): single full-array block + fused argmax.
    x_small = jax.random.normal(k_small, (8, INPUT_DIM), jnp.float32)
    q_small, a_small = jax.block_until_ready(dqn_forward(x_small, prepared))
    assert q_small.shape == (8, OUTPUT_DIM), q_small.shape
    assert a_small.shape == (8, 1), a_small.shape
    # bf16 MXU operands (layers 2/3) -> loosened tolerance vs. the f32 reference.
    assert jnp.allclose(q_small, dqn_reference(x_small, params), atol=5e-2, rtol=5e-2)
    # Fused argmax must exactly match argmax of the kernel's own Q output.
    assert jnp.array_equal(a_small[:, 0], jnp.argmax(q_small, axis=-1).astype(jnp.int32))

    # Larger batch (replay-batch inference): exercises the >=2-block "parallel"
    # grid (v7x 2-TC sharding) including a masked partial final block.
    x_big = jax.random.normal(k_big, (500, INPUT_DIM), jnp.float32)
    q_big, a_big = jax.block_until_ready(dqn_forward(x_big, prepared))
    assert q_big.shape == (500, OUTPUT_DIM), q_big.shape
    assert a_big.shape == (500, 1), a_big.shape
    assert jnp.allclose(q_big, dqn_reference(x_big, params), atol=5e-2, rtol=5e-2)
    assert jnp.array_equal(a_big[:, 0], jnp.argmax(q_big, axis=-1).astype(jnp.int32))

    print("KERNEL_OK")
</pallas_src>

<mosaic_0001>
module attributes {stable_mosaic.version = 11 : i64} {
  func.func @_dqn_kernel(%arg0: i32, %arg1: memref<8x4xf32, #tpu.memory_space<vmem>>, %arg2: memref<4x128xf32, #tpu.memory_space<vmem>>, %arg3: memref<1x128xf32, #tpu.memory_space<vmem>>, %arg4: memref<128x128xbf16, #tpu.memory_space<vmem>>, %arg5: memref<1x128xf32, #tpu.memory_space<vmem>>, %arg6: memref<128x2xbf16, #tpu.memory_space<vmem>>, %arg7: memref<1x2xf32, #tpu.memory_space<vmem>>, %arg8: memref<8x2xf32, #tpu.memory_space<vmem>>, %arg9: memref<8x1xi32, #tpu.memory_space<vmem>>) attributes {dimension_semantics = [#tpu.dimension_semantics<parallel>], iteration_bounds = array<i64: 1>, scalar_prefetch = 0 : i64, scratch_operands = 0 : i64, tpu.core_type = #tpu.core_type<tc>, window_params = [{transform_indices = @transform_0, window_bounds = array<i64: 8, 4>}, {pipeline_mode = #tpu.pipeline_mode<synchronous>, transform_indices = @transform_1, window_bounds = array<i64: 4, 128>}, {pipeline_mode = #tpu.pipeline_mode<synchronous>, transform_indices = @transform_2, window_bounds = array<i64: 1, 128>}, {pipeline_mode = #tpu.pipeline_mode<synchronous>, transform_indices = @transform_3, window_bounds = array<i64: 128, 128>}, {pipeline_mode = #tpu.pipeline_mode<synchronous>, transform_indices = @transform_4, window_bounds = array<i64: 1, 128>}, {pipeline_mode = #tpu.pipeline_mode<synchronous>, transform_indices = @transform_5, window_bounds = array<i64: 128, 2>}, {pipeline_mode = #tpu.pipeline_mode<synchronous>, transform_indices = @transform_6, window_bounds = array<i64: 1, 2>}, {transform_indices = @transform_7, window_bounds = array<i64: 8, 2>}, {transform_indices = @transform_8, window_bounds = array<i64: 8, 1>}]} {
    %c0 = arith.constant 0 : index
    %c0_0 = arith.constant 0 : index
    %0 = vector.load %arg1[%c0, %c0_0] : memref<8x4xf32, #tpu.memory_space<vmem>>, vector<8x4xf32>
    %c0_1 = arith.constant 0 : index
    %c0_2 = arith.constant 0 : index
    %1 = vector.load %arg2[%c0_1, %c0_2] : memref<4x128xf32, #tpu.memory_space<vmem>>, vector<4x128xf32>
    %2 = vector.extract_strided_slice %0 {offsets = [0, 0], sizes = [8, 1], strides = [1, 1]} : vector<8x4xf32> to vector<8x1xf32>
    %3 = vector.extract_strided_slice %1 {offsets = [0, 0], sizes = [1, 128], strides = [1, 1]} : vector<4x128xf32> to vector<1x128xf32>
    %4 = vector.broadcast %2 : vector<8x1xf32> to vector<8x128xf32>
    %5 = vector.broadcast %3 : vector<1x128xf32> to vector<8x128xf32>
    %6 = arith.mulf %4, %5 : vector<8x128xf32>
    %7 = vector.extract_strided_slice %0 {offsets = [0, 1], sizes = [8, 1], strides = [1, 1]} : vector<8x4xf32> to vector<8x1xf32>
    %8 = vector.extract_strided_slice %1 {offsets = [1, 0], sizes = [1, 128], strides = [1, 1]} : vector<4x128xf32> to vector<1x128xf32>
    %9 = vector.broadcast %7 : vector<8x1xf32> to vector<8x128xf32>
    %10 = vector.broadcast %8 : vector<1x128xf32> to vector<8x128xf32>
    %11 = arith.mulf %9, %10 : vector<8x128xf32>
    %12 = arith.addf %6, %11 : vector<8x128xf32>
    %13 = vector.extract_strided_slice %0 {offsets = [0, 2], sizes = [8, 1], strides = [1, 1]} : vector<8x4xf32> to vector<8x1xf32>
    %14 = vector.extract_strided_slice %1 {offsets = [2, 0], sizes = [1, 128], strides = [1, 1]} : vector<4x128xf32> to vector<1x128xf32>
    %15 = vector.broadcast %13 : vector<8x1xf32> to vector<8x128xf32>
    %16 = vector.broadcast %14 : vector<1x128xf32> to vector<8x128xf32>
    %17 = arith.mulf %15, %16 : vector<8x128xf32>
    %18 = arith.addf %12, %17 : vector<8x128xf32>
    %19 = vector.extract_strided_slice %0 {offsets = [0, 3], sizes = [8, 1], strides = [1, 1]} : vector<8x4xf32> to vector<8x1xf32>
    %20 = vector.extract_strided_slice %1 {offsets = [3, 0], sizes = [1, 128], strides = [1, 1]} : vector<4x128xf32> to vector<1x128xf32>
    %21 = vector.broadcast %19 : vector<8x1xf32> to vector<8x128xf32>
    %22 = vector.broadcast %20 : vector<1x128xf32> to vector<8x128xf32>
    %23 = arith.mulf %21, %22 : vector<8x128xf32>
    %24 = arith.addf %18, %23 : vector<8x128xf32>
    %c0_3 = arith.constant 0 : index
    %c0_4 = arith.constant 0 : index
    %25 = vector.load %arg3[%c0_3, %c0_4] : memref<1x128xf32, #tpu.memory_space<vmem>>, vector<1x128xf32>
    %26 = vector.broadcast %25 : vector<1x128xf32> to vector<8x128xf32>
    %27 = arith.addf %24, %26 : vector<8x128xf32>
    %cst = arith.constant 0.000000e+00 : f32
    %28 = vector.broadcast %cst : f32 to vector<8x128xf32>
    %29 = arith.maximumf %27, %28 : vector<8x128xf32>
    %30 = arith.truncf %29 : vector<8x128xf32> to vector<8x128xbf16>
    %c0_5 = arith.constant 0 : index
    %c0_6 = arith.constant 0 : index
    %31 = vector.load %arg4[%c0_5, %c0_6] : memref<128x128xbf16, #tpu.memory_space<vmem>>, vector<128x128xbf16>
    %cst_7 = arith.constant dense<0.000000e+00> : vector<8x128xf32>
    %32 = tpu.matmul %30, %31, %cst_7 {dimension_numbers = #tpu.dot_dimension_numbers<[1], [0], [0], [1], [0, 0, 1, 1], [], []>} : vector<8x128xbf16>, vector<128x128xbf16>, vector<8x128xf32> -> vector<8x128xf32>
    %c0_8 = arith.constant 0 : index
    %c0_9 = arith.constant 0 : index
    %33 = vector.load %arg5[%c0_8, %c0_9] : memref<1x128xf32, #tpu.memory_space<vmem>>, vector<1x128xf32>
    %34 = vector.broadcast %33 : vector<1x128xf32> to vector<8x128xf32>
    %35 = arith.addf %32, %34 : vector<8x128xf32>
    %cst_10 = arith.constant 0.000000e+00 : f32
    %36 = vector.broadcast %cst_10 : f32 to vector<8x128xf32>
    %37 = arith.maximumf %35, %36 : vector<8x128xf32>
    %38 = arith.truncf %37 : vector<8x128xf32> to vector<8x128xbf16>
    %c0_11 = arith.constant 0 : index
    %c0_12 = arith.constant 0 : index
    %39 = vector.load %arg6[%c0_11, %c0_12] : memref<128x2xbf16, #tpu.memory_space<vmem>>, vector<128x2xbf16>
    %cst_13 = arith.constant dense<0.000000e+00> : vector<8x2xf32>
    %40 = tpu.matmul %38, %39, %cst_13 {dimension_numbers = #tpu.dot_dimension_numbers<[1], [0], [0], [1], [0, 0, 1, 1], [], []>} : vector<8x128xbf16>, vector<128x2xbf16>, vector<8x2xf32> -> vector<8x2xf32>
    %c0_14 = arith.constant 0 : index
    %c0_15 = arith.constant 0 : index
    %41 = vector.load %arg7[%c0_14, %c0_15] : memref<1x2xf32, #tpu.memory_space<vmem>>, vector<1x2xf32>
    %42 = vector.broadcast %41 : vector<1x2xf32> to vector<8x2xf32>
    %43 = arith.addf %40, %42 : vector<8x2xf32>
    %c0_16 = arith.constant 0 : index
    %c0_17 = arith.constant 0 : index
    %44 = vector.load %arg8[%c0_16, %c0_17] : memref<8x2xf32, #tpu.memory_space<vmem>>, vector<8x2xf32>
    tpu.vector_store %arg8[%c0_16, %c0_17], %43 {strides = array<i32>} : memref<8x2xf32, #tpu.memory_space<vmem>>, vector<8x2xf32>,
    %45 = tpu.iota {dimensions = array<i32: 1>} : vector<8x2xi32>
    %cst_18 = arith.constant dense<0xFF800000> : vector<8xf32>
    %46 = vector.multi_reduction <maximumf>, %43, %cst_18 [1] : vector<8x2xf32> to vector<8xf32>
    %47 = vector.shape_cast %46 : vector<8xf32> to vector<8x1xf32>
    %48 = vector.broadcast %47 : vector<8x1xf32> to vector<8x2xf32>
    %49 = arith.cmpf oeq, %43, %48 : vector<8x2xf32>
    %c2_i32 = arith.constant 2 : i32
    %50 = vector.broadcast %c2_i32 : i32 to vector<8x2xi32>
    %51 = arith.select %49, %45, %50 : vector<8x2xi1>, vector<8x2xi32>
    %cst_19 = arith.constant dense<2147483647> : vector<8xi32>
    %52 = vector.multi_reduction <minsi>, %51, %cst_19 [1] : vector<8x2xi32> to vector<8xi32>
    %53 = vector.shape_cast %52 : vector<8xi32> to vector<8x1xi32>
    %c0_20 = arith.constant 0 : index
    %c0_21 = arith.constant 0 : index
    %54 = vector.load %arg9[%c0_20, %c0_21] : memref<8x1xi32, #tpu.memory_space<vmem>>, vector<8x1xi32>
    tpu.vector_store %arg9[%c0_20, %c0_21], %53 {strides = array<i32>} : memref<8x1xi32, #tpu.memory_space<vmem>>, vector<8x1xi32>,
    return
  }
  func.func @transform_0(%arg0: i32) -> (i32, i32) {
    %c0_i32 = arith.constant 0 : i32
    %c0_i32_0 = arith.constant 0 : i32
    return %arg0, %c0_i32 : i32, i32
  }
  func.func @transform_1(%arg0: i32) -> (i32, i32) {
    %c0_i32 = arith.constant 0 : i32
    %c0_i32_0 = arith.constant 0 : i32
    %c0_i32_1 = arith.constant 0 : i32
    return %c0_i32, %c0_i32_0 : i32, i32
  }
  func.func @transform_2(%arg0: i32) -> (i32, i32) {
    %c0_i32 = arith.constant 0 : i32
    %c0_i32_0 = arith.constant 0 : i32
    %c0_i32_1 = arith.constant 0 : i32
    return %c0_i32, %c0_i32_0 : i32, i32
  }
  func.func @transform_3(%arg0: i32) -> (i32, i32) {
    %c0_i32 = arith.constant 0 : i32
    %c0_i32_0 = arith.constant 0 : i32
    %c0_i32_1 = arith.constant 0 : i32
    return %c0_i32, %c0_i32_0 : i32, i32
  }
  func.func @transform_4(%arg0: i32) -> (i32, i32) {
    %c0_i32 = arith.constant 0 : i32
    %c0_i32_0 = arith.constant 0 : i32
    %c0_i32_1 = arith.constant 0 : i32
    return %c0_i32, %c0_i32_0 : i32, i32
  }
  func.func @transform_5(%arg0: i32) -> (i32, i32) {
    %c0_i32 = arith.constant 0 : i32
    %c0_i32_0 = arith.constant 0 : i32
    %c0_i32_1 = arith.constant 0 : i32
    return %c0_i32, %c0_i32_0 : i32, i32
  }
  func.func @transform_6(%arg0: i32) -> (i32, i32) {
    %c0_i32 = arith.constant 0 : i32
    %c0_i32_0 = arith.constant 0 : i32
    %c0_i32_1 = arith.constant 0 : i32
    return %c0_i32, %c0_i32_0 : i32, i32
  }
  func.func @transform_7(%arg0: i32) -> (i32, i32) {
    %c0_i32 = arith.constant 0 : i32
    %c0_i32_0 = arith.constant 0 : i32
    return %arg0, %c0_i32 : i32, i32
  }
  func.func @transform_8(%arg0: i32) -> (i32, i32) {
    %c0_i32 = arith.constant 0 : i32
    %c0_i32_0 = arith.constant 0 : i32
    return %arg0, %c0_i32 : i32, i32
  }
}

</mosaic_0001>

<bundles_post_ra>
// kernel: dqn_forward.1
= control target key start
LH: loop header
LB: loop body
LE: loop exit
PB: predicated region body
PF: predicated region fallthrough
CT: control target
= control target key end

     0   :  { %v443_v0 = vmov 0   ;;  %v444_v2 = vmov 2   ;;  %v445_v4 = vmov 0.0   ;;  %v446_v6 = vmov 1   ;;  %s581_s0 = inlined_call_operand.vmem [shape: f32[8,4], index: 0, kind: input, shape index: {}]   ;;  %s582_s3 = inlined_call_operand.vmem [shape: bf16[128,128], index: 3, kind: input, shape index: {}]   ;;  %s583_s5 = inlined_call_operand.vmem [shape: bf16[128,2], index: 5, kind: input, shape index: {}]   ;;  %s584_s1 = inlined_call_operand.vmem [shape: f32[4,128], index: 1, kind: input, shape index: {}]   ;;  %s585_s2 = inlined_call_operand.vmem [shape: f32[1,128], index: 2, kind: input, shape index: {}]   ;;  %s586_s4 = inlined_call_operand.vmem [shape: f32[1,128], index: 4, kind: input, shape index: {}]   ;;  %s587_s6 = inlined_call_operand.vmem [shape: f32[1,2], index: 6, kind: input, shape index: {}]   ;;  %s588_s7 = inlined_call_operand.vmem [shape: f32[8,2], index: 7, kind: output, shape index: {0}]   ;;  %s589_s8 = inlined_call_operand.vmem [shape: s32[8,1], index: 8, kind: output, shape index: {1}]  }
   0x1   :  { %422 = vset.pattern.permute.xlu0 %v443_v0  ;;  %v29_v1 = vld [vmem:[%s581_s0] sm:$0xff]  ;;  %424 = vset.pattern.permute.xlu1 %v444_v2  ;;  %v428_v5 = vld [vmem:[%s582_s3 + $0x8] sm:$0xff]   ;;  %v447_v7 = vmov 3   ;;  %v429_v8 = vld [vmem:[%s582_s3 + $0x10] sm:$0xff]   ;;  %vm448_vm0 = vmmov 0   ;;  %v36_v20 = vlaneseq  ;;  %vm305_vm1 = vcmask 15360  }
   0x2   :  { %33 = vperm.xlu0 %422, %v29_v1   ;;  %52 = vperm.xlu1 %424, %v29_v1   ;;  %v427_v3 = vld [vmem:[%s582_s3] sm:$0xff]   ;;  %v430_v9 = vld [vmem:[%s582_s3 + $0x18] sm:$0xff]   ;;  %v432_v11 = vld [vmem:[%s582_s3 + $0x28] sm:$0xff]   ;;  %vm329_vm4 = vcmask 7168  }
   0x3   :  { %376 = vmatprep.subr.bf16.mxu0 %v445_v4  ;;  %396 = vmatprep.subr.bf16.mxu1 %v445_v4  ;;  %v431_v10 = vld [vmem:[%s582_s3 + $0x20] sm:$0xff]   ;;  %v433_v13 = vld [vmem:[%s582_s3 + $0x30] sm:$0xff]   ;;  %v436_v14 = vld [vmem:[%s583_s5 + $0x8] sm:$0xff]   ;;  %v37_v21 = vshrl.u32 %v36_v20, 7  ;;  %v308_v63 = vand.u32 127, %v36_v20 }
   0x4   :  { %377 = vmatpush3.bf16.msra.mxu0 %v427_v3  ;;  %392 = vmatprep.mubr.msk.bf16.mxu0 %vm448_vm0, %v445_v4  ;;  %v435_v12 = vld [vmem:[%s583_s5] sm:$0xff]   ;;  %v434_v15 = vld [vmem:[%s582_s3 + $0x38] sm:$0xff]   ;;  %v437_v16 = vld [vmem:[%s583_s5 + $0x10] sm:$0xff]  }
   0x5   :  { %378 = vmatprep.subr.bf16.mxu0 %v445_v4  ;;  %412 = vmatprep.mubr.msk.bf16.mxu1 %vm448_vm0, %v445_v4  ;;  %v438_v17 = vld [vmem:[%s583_s5 + $0x18] sm:$0xff]   ;;  %v439_v18 = vld [vmem:[%s583_s5 + $0x20] sm:$0xff]   ;;  %v440_v19 = vld [vmem:[%s583_s5 + $0x28] sm:$0xff]   ;;  %v38_v22 = vsub.s32 0, %v37_v21  ;;  %v47_v23 = vsub.s32 1, %v37_v21  ;;  %v57_v26 = vsub.s32 2, %v37_v21 }
   0x6   :  { %423 = vset.pattern.permute.xlu0 %v446_v6  ;;  %425 = vset.pattern.permute.xlu1 %v447_v7  ;;  %v30_v24 = vld [vmem:[%s584_s1] sm:$0xf]  ;;  %v67_v28 = vsub.s32 3, %v37_v21  ;;  %v441_v46 = vld [vmem:[%s583_s5 + $0x30] sm:$0xff]   ;;  %v442_v47 = vld [vmem:[%s583_s5 + $0x38] sm:$0xff]  }
   0x7   :  { %42 = vperm.xlu0 %423, %v29_v1   ;;  %62 = vperm.xlu1 %425, %v29_v1   ;;  %v39_v29 = vrot.slane %v30_v24, %v38_v22  ;;  %v48_v30 = vrot.slane %v30_v24, %v47_v23  ;;  %v58_v31 = vrot.slane %v30_v24, %v57_v26  ;;  %v339_v41 = vld [vmem:[%s585_s2] ss:$0 sm:$0xff] }
   0x8   :  { %379 = vmatpush3.bf16.msra.mxu0 %v428_v5  ;;  %397 = vmatpush3.bf16.msra.mxu1 %v435_v12  ;;  %v68_v32 = vrot.slane %v30_v24, %v67_v28  ;;  %v340_v48 = vld [vmem:[%s586_s4] ss:$0 sm:$0xff] }
   0x9   :  { %380 = vmatprep.subr.bf16.mxu0 %v445_v4  ;;  %398 = vmatprep.subr.bf16.mxu1 %v445_v4  ;;  %v349_v56 = vld [vmem:[%s587_s6] ss:$0 sm:$0xff] }
   0xb   :  { %426 = vset.pattern.permute.xlu0 %v447_v7 }
   0xc   :  { %381 = vmatpush3.bf16.msra.mxu0 %v429_v8  ;;  %399 = vmatpush3.bf16.msra.mxu1 %v436_v14 }
   0xd   :  { %382 = vmatprep.subr.bf16.mxu0 %v445_v4  ;;  %400 = vmatprep.subr.bf16.mxu1 %v445_v4 }
  0x10   :  { %383 = vmatpush3.bf16.msra.mxu0 %v430_v9  ;;  %401 = vmatpush3.bf16.msra.mxu1 %v437_v16 }
  0x11   :  { %384 = vmatprep.subr.bf16.mxu0 %v445_v4  ;;  %402 = vmatprep.subr.bf16.mxu1 %v445_v4 }
  0x14   :  { %385 = vmatpush3.bf16.msra.mxu0 %v431_v10  ;;  %403 = vmatpush3.bf16.msra.mxu1 %v438_v17 }
  0x15   :  { %386 = vmatprep.subr.bf16.mxu0 %v445_v4  ;;  %404 = vmatprep.subr.bf16.mxu1 %v445_v4 }
  0x18   :  { %387 = vmatpush3.bf16.msra.mxu0 %v432_v11  ;;  %405 = vmatpush3.bf16.msra.mxu1 %v439_v18 }
  0x19   :  { %388 = vmatprep.subr.bf16.mxu0 %v445_v4  ;;  %406 = vmatprep.subr.bf16.mxu1 %v445_v4 }
  0x1c   :  { %389 = vmatpush3.bf16.msra.mxu0 %v433_v13  ;;  %407 = vmatpush3.bf16.msra.mxu1 %v440_v19 }
  0x1d   :  { %390 = vmatprep.subr.bf16.mxu0 %v445_v4  ;;  %408 = vmatprep.subr.bf16.mxu1 %v445_v4 }
  0x20   :  { %391 = vmatpush3.bf16.msra.mxu0 %v434_v15  ;;  %409 = vmatpush3.bf16.msra.mxu1 %v441_v46 }
  0x21   :  { %410 = vmatprep.subr.bf16.mxu1 %v445_v4 }
  0x24   :  { %411 = vmatpush3.bf16.msra.mxu1 %v442_v47 }
  0x81   :  { %v34_v25 = vpop.permute.xlu0 %33  ;;  %v53_v27 = vpop.permute.xlu1 %52 }
  0x82   :  { %v40_v35 = vmul.f32 %v39_v29, %v34_v25  ;;  %v59_v37 = vmul.f32 %v58_v31, %v53_v27 }
  0x86   :  { %v43_v33 = vpop.permute.xlu0 %42  ;;  %v63_v34 = vpop.permute.xlu1 %62 }
  0x87   :  { %v49_v36 = vmul.f32 %v48_v30, %v43_v33  ;;  %v69_v39 = vmul.f32 %v68_v32, %v63_v34 }
  0x89   :  { %v50_v38 = vadd.f32 %v49_v36, %v40_v35 }
  0x8b   :  { %v60_v40 = vadd.f32 %v59_v37, %v50_v38 }
  0x8d   :  { %v70_v42 = vadd.f32 %v69_v39, %v60_v40 }
  0x8f   :  { %v78_v43 = vadd.f32 %v339_v41, %v70_v42 }
  0x91   :  { %v79_v44 = vmax.f32 %v78_v43, 0.0 }
  0x93   :  { %v80_v45 = vpack.c.bf16 %v79_v44, %v79_v44 }
  0x95   :  { %393 = vmatmul.mubr.bf16.vlgmr.msra.gmra.mrb[0].mxu0 %v80_v45 }
 0x168   :  { %v186_v49 = vpop.f32.mrb[0].mxu0 }
 0x169   :  { %v187_v50 = vadd.f32 %v340_v48, %v186_v49  ;;  %v394_v51 = vpop.f32.mrb[1].mxu0 }
 0x16a   :  { %v189_v52 = vpop.f32.mrb[2].mxu0 }
 0x16b   :  { %v192_v53 = vmax.f32 %v187_v50, 0.0  ;;  %v395_v54 = vpop.f32.mrb[3].mxu0 }
 0x16d   :  { %v193_v55 = vpack.c.bf16 %v192_v53, %v192_v53 }
 0x16f   :  { %413 = vmatmul.mubr.bf16.vlgmr.msra.gmra.mrb[0].mxu1 %v193_v55 }
 0x242   :  { %v299_v57 = vpop.f32.mrb[0].mxu1 }
 0x243   :  { %v300_v58 = vadd.f32 %v349_v56, %v299_v57  ;;  %v414_v59 = vpop.f32.mrb[1].mxu1 }
 0x244   :  { %v302_v60 = vpop.f32.mrb[2].mxu1 }
 0x245   :  { %v415_v61 = vpop.f32.mrb[3].mxu1  ;;  %v309_v62 = vsel %vm305_vm1, %v300_v58, -inf  ;;  %306 = vst.msk [vmem:[%s588_s7] sm:$0xff] %vm305_vm1, %v300_v58 }
 0x246   :  { %310 = vmax.xlane.f32.xlu1 %v309_v62 }
 0x2d3   :  { %v311_v0 = vpop.xlane.xlu1 %310 }
 0x2d4   :  { %vm312_vm2 = vcmp.eq.f32.partialorder %v300_v58, %v311_v0 }
 0x2d5   :  { %v313_v1 = vsel %vm312_vm2, %v308_v63, 2 }
 0x2d6   :  { %v314_v2 = vsel %vm305_vm1, %v313_v1, 2147483647 }
 0x2d7   :  { %v316_v3 = vshra.s32 %v314_v2, 16  ;;  %v315_v5 = vand.u32 65535, %v314_v2 }
 0x2d9   :  { %v318_v4 = vcvt.s32.f32 %v316_v3  ;;  %v317_v7 = vcvt.s32.f32 %v315_v5 }
 0x2db   :  { %319 = vmin.xlane.f32.xlu0 %v318_v4 }
 0x368   :  { %v320_v6 = vpop.xlane.xlu0 %319 }
 0x369   :  { %vm321_vm3 = vcmp.eq.f32.partialorder %v318_v4, %v320_v6  ;;  %v326_v9 = vcvt.f32.s32 %v320_v6 }
 0x36a   :  { %v322_v8 = vsel %vm321_vm3, %v317_v7, inf }
 0x36b   :  { %323 = vmin.xlane.f32.xlu0 %v322_v8  ;;  %v327_v11 = vshll.u32 %v326_v9, 16 }
 0x3f8   :  { %v324_v10 = vpop.xlane.xlu0 %323 }
 0x3f9   :  { %v325_v12 = vcvt.f32.s32 %v324_v10 }
 0x3fb   :  { %v328_v13 = vadd.s32 %v327_v11, %v325_v12 }
 0x3fd   :  { %330 = vst.msk [vmem:[%s589_s8] sm:$0xff] %vm329_vm4, %v328_v13 }

</bundles_post_ra>
